<compile_context>
chip_gen: v7x
topology: tpu7x:2x2x1
jax: 0.10.0
libtpu: 0.0.40
codegen_flags: <defaults>
</compile_context>

<pallas_src>
import jax
import jax.numpy as jnp
from jax.experimental import pallas as pl
from jax.experimental.pallas import tpu as pltpu

BN_EPS = 1e-5
GIN_EPS = 0.0        # PyG GINConv default eps
LANE = 128           # lane padding for feature / hidden dims
ROW_TILE = 256       # tm: rows of A' per grid step
K_TILE = 256         # tk: contraction (neighbor) tile; equal to ROW_TILE so a
                     # single padding granularity serves both grid axes
VMEM_LIMIT = 48 * 1024 * 1024   # v7x-safe scoped VMEM budget


def _round_up(v, m):
    return ((v + m - 1) // m) * m


def gin_matmul_stats_kernel(a_ref, x_ref, w_ref, h_ref, stats_ref, acc_ref):
    """Grid step (row-tile i, contraction-tile k).

    a_ref:     (tm, tk) bf16 tile of A' = A + (1+eps) I        (zero padded)
    x_ref:     (tk, Fp) bf16 tile of node features             (zero padded)
    w_ref:     (Fp, Hp) bf16 W^T (full, resident across grid)
    h_ref:     (tm, Hp) f32 output tile of pre-BN activations
    stats_ref: (2, Hp)  f32 per-row-tile partial [col_sum; col_sum_sq]
    acc_ref:   (tm, Fp) f32 VMEM accumulator for z = A' @ x
    """
    k = pl.program_id(1)

    @pl.when(k == 0)
    def _():
        acc_ref[...] = jnp.zeros_like(acc_ref)

    # GIN aggregation + self term: accumulate one contraction tile on the MXU.
    acc_ref[...] += jnp.dot(a_ref[...], x_ref[...],
                            preferred_element_type=jnp.float32)

    @pl.when(k == pl.num_programs(1) - 1)
    def _():
        # Linear layer (bias omitted — cancelled exactly by BN mean subtract).
        h = jnp.dot(acc_ref[...].astype(jnp.bfloat16), w_ref[...],
                    preferred_element_type=jnp.float32)          # (tm, Hp) f32
        h_ref[...] = h
        # Partial BatchNorm statistics for this row tile (padded rows are 0,
        # so they contribute nothing; the wrapper divides by the real N).
        stats_ref[0:1, :] = jnp.sum(h, axis=0, keepdims=True)
        stats_ref[1:2, :] = jnp.sum(h * h, axis=0, keepdims=True)


def bn_apply_kernel(h_ref, scale_ref, shift_ref, out_ref):
    """Elementwise BN apply: out = h * scale + shift (lane-dense tiles)."""
    out_ref[...] = h_ref[...] * scale_ref[...] + shift_ref[...]


def gin_encoder_forward(x, adj_dense, weight, gamma, beta):
    """x: [N, F] f32; adj_dense: [N, N] f32 with A[dst, src] = edge count;
    weight: [H, F] f32 (PyTorch Linear layout); gamma/beta: [H] f32."""
    N, F = x.shape
    H = weight.shape[0]

    Fp = _round_up(max(F, LANE), LANE)
    Hp = _round_up(max(H, LANE), LANE)
    Np = _round_up(max(N, ROW_TILE), ROW_TILE)
    tm, tk = ROW_TILE, K_TILE
    n_row_tiles = Np // tm
    n_k_tiles = Np // tk

    # A' = A + (1+eps) I without materializing an N x N identity.
    diag = jnp.arange(N)
    a = adj_dense.at[diag, diag].add(1.0 + GIN_EPS)

    a_p = jnp.zeros((Np, Np), jnp.bfloat16).at[:N, :N].set(a.astype(jnp.bfloat16))
    x_p = jnp.zeros((Np, Fp), jnp.bfloat16).at[:N, :F].set(x.astype(jnp.bfloat16))
    w_p = jnp.zeros((Fp, Hp), jnp.bfloat16).at[:F, :H].set(
        weight.T.astype(jnp.bfloat16))
    # Padded lanes get gamma = beta = 0 -> exact zero on padded output lanes.
    gamma_p = jnp.zeros((Hp,), jnp.float32).at[:H].set(gamma)
    beta_p = jnp.zeros((Hp,), jnp.float32).at[:H].set(beta)

    # ---- Kernel 1: tiled (A' @ x) @ W^T with per-row-tile BN partial stats.
    h, stats = pl.pallas_call(
        gin_matmul_stats_kernel,
        out_shape=(jax.ShapeDtypeStruct((Np, Hp), jnp.float32),
                   jax.ShapeDtypeStruct((n_row_tiles, 2, Hp), jnp.float32)),
        grid_spec=pltpu.PrefetchScalarGridSpec(
            num_scalar_prefetch=0,
            grid=(n_row_tiles, n_k_tiles),
            in_specs=[
                pl.BlockSpec((tm, tk), lambda i, k: (i, k)),   # A' tile
                pl.BlockSpec((tk, Fp), lambda i, k: (k, 0)),   # x tile
                pl.BlockSpec((Fp, Hp), lambda i, k: (0, 0)),   # W^T (resident)
            ],
            out_specs=(
                pl.BlockSpec((tm, Hp), lambda i, k: (i, 0)),           # h
                pl.BlockSpec((None, 2, Hp), lambda i, k: (i, 0, 0)),   # stats
            ),
            scratch_shapes=[pltpu.VMEM((tm, Fp), jnp.float32)]),
        compiler_params=pltpu.CompilerParams(
            dimension_semantics=("parallel", "arbitrary"),
            vmem_limit_bytes=VMEM_LIMIT),
    )(a_p, x_p, w_p)

    # ---- Tiny XLA reduction: per-tile partials -> full-N column statistics.
    s = jnp.sum(stats[:, 0, :], axis=0)               # (Hp,)
    ss = jnp.sum(stats[:, 1, :], axis=0)               # (Hp,)
    inv_n = 1.0 / N                                     # real N, not padded Np
    mean = s * inv_n
    var = ss * inv_n - mean * mean                      # biased variance
    scale = gamma_p * jax.lax.rsqrt(var + BN_EPS)
    shift = beta_p - mean * scale

    # ---- Kernel 2: lane-dense elementwise BN apply over row tiles.
    out_p = pl.pallas_call(
        bn_apply_kernel,
        out_shape=jax.ShapeDtypeStruct((Np, Hp), jnp.float32),
        grid_spec=pltpu.PrefetchScalarGridSpec(
            num_scalar_prefetch=0,
            grid=(n_row_tiles,),
            in_specs=[
                pl.BlockSpec((tm, Hp), lambda i: (i, 0)),
                pl.BlockSpec((1, Hp), lambda i: (0, 0)),
                pl.BlockSpec((1, Hp), lambda i: (0, 0)),
            ],
            out_specs=pl.BlockSpec((tm, Hp), lambda i: (i, 0))),
        compiler_params=pltpu.CompilerParams(
            dimension_semantics=("parallel",),
            vmem_limit_bytes=VMEM_LIMIT),
    )(h, scale.reshape(1, Hp), shift.reshape(1, Hp))

    # TODO(synk): downstream consumers could take the padded f32/bf16 slab
    #             directly instead of this slice to save an XLA copy.
    return out_p[:N, :H]


def build_dense_adj(edge_index, num_nodes):
    # A[dst, src] = number of edges src -> dst, so A @ x sums neighbor features.
    src = edge_index[0]
    dst = edge_index[1]
    a = jnp.zeros((num_nodes, num_nodes), jnp.float32)
    return a.at[dst, src].add(1.0)


def gin_encoder_reference(x, adj_dense, weight, bias, gamma, beta):
    """Pure-JAX f32 reference mirroring the PyTorch module (with bias)."""
    z = (1.0 + GIN_EPS) * x + adj_dense @ x
    h = z @ weight.T + bias
    mean = jnp.mean(h, axis=0)
    var = jnp.mean((h - mean) ** 2, axis=0)
    return gamma * (h - mean) * jax.lax.rsqrt(var + BN_EPS) + beta


if __name__ == "__main__":
    key = jax.random.PRNGKey(0)
    k_x, k_e, k_w, k_b = jax.random.split(key, 4)

    # Small problem consistent with the module: N nodes, num_features -> hidden.
    N = 32
    NUM_FEATURES = 16
    HIDDEN = 32
    NUM_EDGES = 96

    x = jax.random.normal(k_x, (N, NUM_FEATURES), jnp.float32)
    edge_index = jax.random.randint(k_e, (2, NUM_EDGES), 0, N)
    adj_dense = build_dense_adj(edge_index, N)

    # PyTorch Linear default init; BatchNorm gamma=1, beta=0.  The Linear bias
    # is provably cancelled by BN's mean subtraction (see reference check).
    bound = 1.0 / (NUM_FEATURES ** 0.5)
    weight = jax.random.uniform(
        k_w, (HIDDEN, NUM_FEATURES), jnp.float32, minval=-bound, maxval=bound)
    bias = jax.random.uniform(
        k_b, (HIDDEN,), jnp.float32, minval=-bound, maxval=bound)
    gamma = jnp.ones((HIDDEN,), jnp.float32)
    beta = jnp.zeros((HIDDEN,), jnp.float32)

    out = gin_encoder_forward(x, adj_dense, weight, gamma, beta)
    jax.block_until_ready(out)

    assert out.shape == (N, HIDDEN)
    assert bool(jnp.all(jnp.isfinite(out)))

    # Loose-tolerance check vs f32 reference (bf16 matmul operands).
    ref = gin_encoder_reference(x, adj_dense, weight, bias, gamma, beta)
    max_err = float(jnp.max(jnp.abs(out - ref)))
    assert max_err < 0.15, f"max abs error vs reference: {max_err}"

    print("KERNEL_OK")
</pallas_src>

<mosaic_0001>
module attributes {stable_mosaic.version = 11 : i64} {
  func.func @gin_matmul_stats_kernel(%arg0: i32, %arg1: i32, %arg2: memref<256x256xbf16, #tpu.memory_space<vmem>>, %arg3: memref<256x128xbf16, #tpu.memory_space<vmem>>, %arg4: memref<128x128xbf16, #tpu.memory_space<vmem>>, %arg5: memref<256x128xf32, #tpu.memory_space<vmem>>, %arg6: memref<1x2x128xf32, #tpu.memory_space<vmem>>, %arg7: memref<256x128xf32, #tpu.memory_space<vmem>>) attributes {dimension_semantics = [#tpu.dimension_semantics<parallel>, #tpu.dimension_semantics<arbitrary>], iteration_bounds = array<i64: 1, 1>, scalar_prefetch = 0 : i64, scratch_operands = 1 : i64, tpu.core_type = #tpu.core_type<tc>, window_params = [{transform_indices = @transform_0, window_bounds = array<i64: 256, 256>}, {transform_indices = @transform_1, window_bounds = array<i64: 256, 128>}, {pipeline_mode = #tpu.pipeline_mode<synchronous>, transform_indices = @transform_2, window_bounds = array<i64: 128, 128>}, {transform_indices = @transform_3, window_bounds = array<i64: 256, 128>}, {transform_indices = @transform_4, window_bounds = array<i64: 1, 2, 128>}]} {
    %c0_i32 = arith.constant 0 : i32
    %0 = arith.cmpi eq, %arg1, %c0_i32 : i32
    %1 = arith.extui %0 : i1 to i32
    %c0_i32_0 = arith.constant 0 : i32
    %2 = arith.cmpi ne, %1, %c0_i32_0 : i32
    scf.if %2 {
      %cst_10 = arith.constant 0.000000e+00 : f32
      %12 = vector.broadcast %cst_10 : f32 to vector<256x128xf32>
      %c0_11 = arith.constant 0 : index
      %c0_12 = arith.constant 0 : index
      %13 = vector.load %arg7[%c0_11, %c0_12] : memref<256x128xf32, #tpu.memory_space<vmem>>, vector<256x128xf32>
      tpu.vector_store %arg7[%c0_11, %c0_12], %12 {strides = array<i32>} : memref<256x128xf32, #tpu.memory_space<vmem>>, vector<256x128xf32>,
    } else {
    }
    %c0 = arith.constant 0 : index
    %c0_1 = arith.constant 0 : index
    %3 = vector.load %arg7[%c0, %c0_1] : memref<256x128xf32, #tpu.memory_space<vmem>>, vector<256x128xf32>
    %c0_2 = arith.constant 0 : index
    %c0_3 = arith.constant 0 : index
    %4 = vector.load %arg2[%c0_2, %c0_3] : memref<256x256xbf16, #tpu.memory_space<vmem>>, vector<256x256xbf16>
    %c0_4 = arith.constant 0 : index
    %c0_5 = arith.constant 0 : index
    %5 = vector.load %arg3[%c0_4, %c0_5] : memref<256x128xbf16, #tpu.memory_space<vmem>>, vector<256x128xbf16>
    %cst = arith.constant dense<0.000000e+00> : vector<256x128xf32>
    %6 = tpu.matmul %4, %5, %cst {dimension_numbers = #tpu.dot_dimension_numbers<[1], [0], [0], [1], [0, 0, 1, 1], [], []>} : vector<256x256xbf16>, vector<256x128xbf16>, vector<256x128xf32> -> vector<256x128xf32>
    %7 = arith.addf %3, %6 : vector<256x128xf32>
    %c0_6 = arith.constant 0 : index
    %c0_7 = arith.constant 0 : index
    %8 = vector.load %arg7[%c0_6, %c0_7] : memref<256x128xf32, #tpu.memory_space<vmem>>, vector<256x128xf32>
    tpu.vector_store %arg7[%c0_6, %c0_7], %7 {strides = array<i32>} : memref<256x128xf32, #tpu.memory_space<vmem>>, vector<256x128xf32>,
    %c0_i32_8 = arith.constant 0 : i32
    %9 = arith.cmpi eq, %arg1, %c0_i32_8 : i32
    %10 = arith.extui %9 : i1 to i32
    %c0_i32_9 = arith.constant 0 : i32
    %11 = arith.cmpi ne, %10, %c0_i32_9 : i32
    scf.if %11 {
      %c0_10 = arith.constant 0 : index
      %c0_11 = arith.constant 0 : index
      %12 = vector.load %arg7[%c0_10, %c0_11] : memref<256x128xf32, #tpu.memory_space<vmem>>, vector<256x128xf32>
      %13 = arith.truncf %12 : vector<256x128xf32> to vector<256x128xbf16>
      %c0_12 = arith.constant 0 : index
      %c0_13 = arith.constant 0 : index
      %14 = vector.load %arg4[%c0_12, %c0_13] : memref<128x128xbf16, #tpu.memory_space<vmem>>, vector<128x128xbf16>
      %cst_14 = arith.constant dense<0.000000e+00> : vector<256x128xf32>
      %15 = tpu.matmul %13, %14, %cst_14 {dimension_numbers = #tpu.dot_dimension_numbers<[1], [0], [0], [1], [0, 0, 1, 1], [], []>} : vector<256x128xbf16>, vector<128x128xbf16>, vector<256x128xf32> -> vector<256x128xf32>
      %c0_15 = arith.constant 0 : index
      %c0_16 = arith.constant 0 : index
      %16 = vector.load %arg5[%c0_15, %c0_16] : memref<256x128xf32, #tpu.memory_space<vmem>>, vector<256x128xf32>
      tpu.vector_store %arg5[%c0_15, %c0_16], %15 {strides = array<i32>} : memref<256x128xf32, #tpu.memory_space<vmem>>, vector<256x128xf32>,
      %cst_17 = arith.constant dense<0.000000e+00> : vector<128xf32>
      %17 = vector.multi_reduction <add>, %15, %cst_17 [0] : vector<256x128xf32> to vector<128xf32>
      %18 = vector.shape_cast %17 : vector<128xf32> to vector<1x128xf32>
      %c0_18 = arith.constant 0 : index
      %c0_19 = arith.constant 0 : index
      %c0_20 = arith.constant 0 : index
      %19 = vector.load %arg6[%c0_18, %c0_19, %c0_20] : memref<1x2x128xf32, #tpu.memory_space<vmem>>, vector<1x1x128xf32>
      %20 = vector.shape_cast %19 : vector<1x1x128xf32> to vector<1x128xf32>
      %21 = vector.shape_cast %18 : vector<1x128xf32> to vector<1x1x128xf32>
      tpu.vector_store %arg6[%c0_18, %c0_19, %c0_20], %21 {strides = array<i32>} : memref<1x2x128xf32, #tpu.memory_space<vmem>>, vector<1x1x128xf32>,
      %22 = arith.mulf %15, %15 : vector<256x128xf32>
      %cst_21 = arith.constant dense<0.000000e+00> : vector<128xf32>
      %23 = vector.multi_reduction <add>, %22, %cst_21 [0] : vector<256x128xf32> to vector<128xf32>
      %24 = vector.shape_cast %23 : vector<128xf32> to vector<1x128xf32>
      %c0_22 = arith.constant 0 : index
      %c1 = arith.constant 1 : index
      %c0_23 = arith.constant 0 : index
      %25 = vector.load %arg6[%c0_22, %c1, %c0_23] : memref<1x2x128xf32, #tpu.memory_space<vmem>>, vector<1x1x128xf32>
      %26 = vector.shape_cast %25 : vector<1x1x128xf32> to vector<1x128xf32>
      %27 = vector.shape_cast %24 : vector<1x128xf32> to vector<1x1x128xf32>
      tpu.vector_store %arg6[%c0_22, %c1, %c0_23], %27 {strides = array<i32>} : memref<1x2x128xf32, #tpu.memory_space<vmem>>, vector<1x1x128xf32>,
    } else {
    }
    return
  }
  func.func @transform_0(%arg0: i32, %arg1: i32) -> (i32, i32) {
    %c0_i32 = arith.constant 0 : i32
    return %arg0, %arg1 : i32, i32
  }
  func.func @transform_1(%arg0: i32, %arg1: i32) -> (i32, i32) {
    %c0_i32 = arith.constant 0 : i32
    %c0_i32_0 = arith.constant 0 : i32
    return %arg1, %c0_i32 : i32, i32
  }
  func.func @transform_2(%arg0: i32, %arg1: i32) -> (i32, i32) {
    %c0_i32 = arith.constant 0 : i32
    %c0_i32_0 = arith.constant 0 : i32
    %c0_i32_1 = arith.constant 0 : i32
    return %c0_i32, %c0_i32_0 : i32, i32
  }
  func.func @transform_3(%arg0: i32, %arg1: i32) -> (i32, i32) {
    %c0_i32 = arith.constant 0 : i32
    %c0_i32_0 = arith.constant 0 : i32
    return %arg0, %c0_i32 : i32, i32
  }
  func.func @transform_4(%arg0: i32, %arg1: i32) -> (i32, i32, i32) {
    %c0_i32 = arith.constant 0 : i32
    %c0_i32_0 = arith.constant 0 : i32
    %c0_i32_1 = arith.constant 0 : i32
    return %arg0, %c0_i32, %c0_i32_0 : i32, i32, i32
  }
}

</mosaic_0001>

<bundles_post_ra>
// kernel: tpu_custom_call.1
= control target key start
LH: loop header
LB: loop body
LE: loop exit
PB: predicated region body
PF: predicated region fallthrough
CT: control target
= control target key end

     0   :  { %10 = vsyncpa [#allocation4], 0  ;;  %s1718_s0 = inlined_call_operand.hbm [shape: bf16[256,256], index: 0, kind: input, shape index: {}]   ;;  %s1719_s1 = inlined_call_operand.hbm [shape: bf16[256,128], index: 1, kind: input, shape index: {}]   ;;  %s1720_s2 = inlined_call_operand.hbm [shape: bf16[128,128], index: 2, kind: input, shape index: {}]   ;;  %s1721_s3 = inlined_call_operand.hbm [shape: f32[256,128], index: 3, kind: output, shape index: {0}]   ;;  %s1722_s4 = inlined_call_operand.hbm [shape: f32[1,2,128], index: 4, kind: output, shape index: {1}]  }
   0x1   :  { %11 = vsyncpa [#allocation7], 0 }
   0x2   :  { %12 = vsyncpa [#allocation5], 0 }
   0x3   :  { %13 = vsyncpa [#allocation11], 0  ;;  %s1576_s15 = smov [#allocation6]   ;;  %s1458_s19 = scalar_lea.hbm %s1719_s1, 2048 }
   0x4   :  { %s31_s16 = sshll.u32 %s1576_s15, 4  ;;  %p1459_p0 = scmp.ne.s32.totalorder %s1719_s1, %s1458_s19  ;;  %s32_s16 = int_to_ptr.vmem [resolvable:$true] %s31_s16 }
   0x5   :  { %p1462_p1 = scmp.lt.u32.totalorder %s1458_s19, %s1719_s1 }
   0x7   :  { %p1464_p2 = pnand %p1462_p1, %p1459_p0 }
   0x9   :  { %1467 = shalt.err (!%p1464_p2)
}
   0xa   :  { %s1468_s24 = scalar_lea.vmem %s32_s16, 2048  ;;  %p1473_p4 = scmp.lt.s32.totalorder %s32_s16, %s32_s16 }
   0xb   :  { %p1469_p3 = scmp.ne.s32.totalorder %s32_s16, %s1468_s24  ;;  %p1474_p5 = scmp.lt.s32.totalorder %s1468_s24, %s1468_s24 }
   0xd   :  { %p1475_p6 = por %p1474_p5, %p1473_p4 }
   0xf   :  { %p1476_p7 = pnand %p1475_p6, %p1469_p3 }
  0x11   :  { %1479 = shalt.err (!%p1476_p7)
}
  0x12   :  { %s1577_s25 = smov 64   ;;  %s1578_s26 = smov 4  }
  0x13   :  { %37 = dma.hbm_to_vmem [thread:$0]  %s1719_s1, 2048, %s32_s16, [#allocation7], %s1577_s25, %s1577_s25, %s1578_s26  }
  0x14   :  { %s1579_s29 = smov [#allocation3]   ;;  %s1480_s7 = scalar_lea.hbm %s1718_s0, 4096 }
  0x15   :  { %s19_s30 = sshll.u32 %s1579_s29, 4  ;;  %p1481_p8 = scmp.ne.s32.totalorder %s1718_s0, %s1480_s7  ;;  %s20_s30 = int_to_ptr.vmem [resolvable:$true] %s19_s30 }
  0x16   :  { %p1484_p9 = scmp.lt.u32.totalorder %s1480_s7, %s1718_s0 }
  0x18   :  { %p1486_p10 = pnand %p1484_p9, %p1481_p8 }
  0x1a   :  { %1489 = shalt.err (!%p1486_p10)
}
  0x1b   :  { %s1490_s12 = scalar_lea.vmem %s20_s30, 4096  ;;  %p1495_p12 = scmp.lt.s32.totalorder %s20_s30, %s20_s30 }
  0x1c   :  { %p1491_p11 = scmp.ne.s32.totalorder %s20_s30, %s1490_s12  ;;  %p1496_p13 = scmp.lt.s32.totalorder %s1490_s12, %s1490_s12 }
  0x1e   :  { %p1497_p0 = por %p1496_p13, %p1495_p12 }
  0x20   :  { %p1498_p1 = pnand %p1497_p0, %p1491_p11 }
  0x22   :  { %1501 = shalt.err (!%p1498_p1)
}
  0x23   :  { %s1580_s1 = smov 128   ;;  %s1581_s13 = smov 8  }
  0x24   :  { %25 = dma.hbm_to_vmem [thread:$0]  %s1718_s0, 4096, %s20_s30, [#allocation4], %s1580_s1, %s1580_s1, %s1581_s13  }
  0x25   :  { %s1582_s16 = smov [#allocation8]   ;;  %s1502_s20 = scalar_lea.hbm %s1720_s2, 1024 }
  0x26   :  { %s43_s17 = sshll.u32 %s1582_s16, 4  ;;  %p1503_p2 = scmp.ne.s32.totalorder %s1720_s2, %s1502_s20  ;;  %s44_s17 = int_to_ptr.vmem [resolvable:$true] %s43_s17 }
  0x27   :  { %p1506_p3 = scmp.lt.u32.totalorder %s1502_s20, %s1720_s2 }
  0x29   :  { %p1508_p4 = pnand %p1506_p3, %p1503_p2 }
  0x2b   :  { %1511 = shalt.err (!%p1508_p4)
}
  0x2c   :  { %s1512_s27 = scalar_lea.vmem %s44_s17, 1024  ;;  %p1517_p6 = scmp.lt.s32.totalorder %s44_s17, %s44_s17 }
  0x2d   :  { %p1513_p5 = scmp.ne.s32.totalorder %s44_s17, %s1512_s27  ;;  %p1518_p7 = scmp.lt.s32.totalorder %s1512_s27, %s1512_s27 }
  0x2f   :  { %p1519_p8 = por %p1518_p7, %p1517_p6 }
  0x31   :  { %p1520_p9 = pnand %p1519_p8, %p1513_p5 }
  0x33   :  { %1523 = shalt.err (!%p1520_p9)
}
  0x34   :  { %49 = dma.hbm_to_vmem [thread:$0]  %s1720_s2, 1024, %s44_s17, [#allocation7], %s1577_s25, %s1577_s25, %s1578_s26  }
  0x35   :  { %1568 = dma.done.wait [#allocation4], 4096  }
  0x36   :  { %1569 = vsyncadd [#allocation4], 4294963200 }
  0x37   :  { %1570 = dma.done.wait [#allocation7], 3072  }
  0x38   :  { %1571 = vsyncadd [#allocation7], 4294964224  ;;  %v1386_v0 = vld [vmem:[#allocation6 + $0x40] sm:$0xff]   ;;  %v1388_v2 = vld [vmem:[#allocation6 + $0x48] sm:$0xff]   ;;  %s1583_s2 = smov [#allocation9]  }
  0x39   :  { %v1387_v1 = vld [vmem:[#allocation6] sm:$0xff]   ;;  %1177 = vmatprep.subr.bf16.mxu0 %v1386_v0  ;;  %1361 = vmatprep.subr.bf16.mxu1 %v1386_v0  ;;  %v1389_v3 = vld [vmem:[#allocation6 + $0x8] sm:$0xff]   ;;  %v1390_v4 = vld [vmem:[#allocation6 + $0x50] sm:$0xff]   ;;  %s1094_s25 = sshll.u32 %s1583_s2, 4  ;;  %s1095_s25 = int_to_ptr.vmem [resolvable:$true] %s1094_s25 }
  0x3a   :  { %1178 = vmatpush3.bf16.msra.mxu0 %v1387_v1  ;;  %1369 = vmatpush3.bf16.msra.mxu1 %v1387_v1  ;;  %v1391_v5 = vld [vmem:[#allocation6 + $0x10] sm:$0xff]   ;;  %v1392_v6 = vld [vmem:[#allocation6 + $0x58] sm:$0xff]   ;;  %v1394_v8 = vld [vmem:[#allocation6 + $0x60] sm:$0xff]   ;;  %s1524_s26 = scalar_lea.vmem %s1095_s25, 4096  ;;  %p1529_p11 = scmp.lt.s32.totalorder %s1095_s25, %s1095_s25 }
  0x3b   :  { %1179 = vmatprep.subr.bf16.mxu0 %v1388_v2  ;;  %1362 = vmatprep.subr.bf16.mxu1 %v1388_v2  ;;  %v1393_v7 = vld [vmem:[#allocation6 + $0x18] sm:$0xff]   ;;  %v1395_v9 = vld [vmem:[#allocation6 + $0x20] sm:$0xff]   ;;  %v1396_v10 = vld [vmem:[#allocation6 + $0x68] sm:$0xff]   ;;  %p1525_p10 = scmp.ne.s32.totalorder %s1095_s25, %s1524_s26  ;;  %p1530_p12 = scmp.lt.s32.totalorder %s1524_s26, %s1524_s26 }
  0x3c   :  { %v1404_v11 = vld [vmem:[#allocation3 + $0x4] ss:$8 sps:$4 sm:$0xff]   ;;  %v1398_v13 = vld [vmem:[#allocation6 + $0x70] sm:$0xff]   ;;  %v1400_v15 = vld [vmem:[#allocation6 + $0x78] sm:$0xff]  }
  0x3d   :  { %v1397_v12 = vld [vmem:[#allocation6 + $0x28] sm:$0xff]   ;;  %480 = vmatprep.mubr.bf16.mxu0 %v1404_v11  ;;  %v1399_v14 = vld [vmem:[#allocation6 + $0x30] sm:$0xff]   ;;  %v1401_v16 = vld [vmem:[#allocation6 + $0x38] sm:$0xff]   ;;  %p1531_p13 = por %p1530_p12, %p1529_p11 }
  0x3e   :  { %1180 = vmatpush3.bf16.msra.mxu0 %v1389_v3  ;;  %1370 = vmatpush3.bf16.msra.mxu1 %v1389_v3  ;;  %v1402_v17 = vld [vmem:[#allocation3] ss:$8 sps:$4 sm:$0xff]   ;;  %v1434_v18 = vld [vmem:[#allocation3 + $0xc4] ss:$8 sps:$4 sm:$0xff]   ;;  %v1405_v19 = vld [vmem:[#allocation3 + $0x14] ss:$8 sps:$4 sm:$0xff]  }
  0x3f   :  { %1181 = vmatprep.subr.bf16.mxu0 %v1390_v4  ;;  %1363 = vmatprep.subr.bf16.mxu1 %v1390_v4  ;;  %v1432_v20 = vld [vmem:[#allocation3 + $0xc0] ss:$8 sps:$4 sm:$0xff]   ;;  %v1438_v21 = vld [vmem:[#allocation3 + $0xd4] ss:$8 sps:$4 sm:$0xff]   ;;  %v1407_v22 = vld [vmem:[#allocation3 + $0x10] ss:$8 sps:$4 sm:$0xff]   ;;  %p1532_p0 = pnand %p1531_p13, %p1525_p10 }
  0x40   :  { %576 = vmatprep.mubr.bf16.mxu1 %v1434_v18  ;;  %v1408_v23 = vld [vmem:[#allocation3 + $0x24] ss:$8 sps:$4 sm:$0xff]   ;;  %v1440_v24 = vld [vmem:[#allocation3 + $0xd0] ss:$8 sps:$4 sm:$0xff]   ;;  %v1410_v29 = vld [vmem:[#allocation3 + $0x20] ss:$8 sps:$4 sm:$0xff]  }
  0x41   :  { %v1450_v25 = vld [vmem:[#allocation8] sm:$0xff]   ;;  %v1451_v26 = vld [vmem:[#allocation8 + $0x8] sm:$0xff]   ;;  %v1452_v28 = vld [vmem:[#allocation8 + $0x10] sm:$0xff]  }
  0x42   :  { %1182 = vmatpush3.bf16.msra.mxu0 %v1391_v5  ;;  %1371 = vmatpush3.bf16.msra.mxu1 %v1391_v5  ;;  %v1444_v27 = vld [vmem:[#allocation3 + $0xe4] ss:$8 sps:$4 sm:$0xff]   ;;  %v1453_v30 = vld [vmem:[#allocation8 + $0x18] sm:$0xff]   ;;  %v1446_v32 = vld [vmem:[#allocation3 + $0xe0] ss:$8 sps:$4 sm:$0xff]  }
  0x43   :  { %1183 = vmatprep.subr.bf16.mxu0 %v1392_v6  ;;  %1364 = vmatprep.subr.bf16.mxu1 %v1392_v6  ;;  %v1411_v31 = vld [vmem:[#allocation3 + $0x34] ss:$8 sps:$4 sm:$0xff]   ;;  %v1413_v34 = vld [vmem:[#allocation3 + $0x30] ss:$8 sps:$4 sm:$0xff]   ;;  %v1414_v35 = vld [vmem:[#allocation3 + $0x44] ss:$8 sps:$4 sm:$0xff]  }
  0x44   :  { %v1447_v33 = vld [vmem:[#allocation3 + $0xf4] ss:$8 sps:$4 sm:$0xff]   ;;  %v1449_v36 = vld [vmem:[#allocation3 + $0xf0] ss:$8 sps:$4 sm:$0xff]   ;;  %v1416_v37 = vld [vmem:[#allocation3 + $0x40] ss:$8 sps:$4 sm:$0xff]  }
  0x45   :  { %v1417_v38 = vld [vmem:[#allocation3 + $0x54] ss:$8 sps:$4 sm:$0xff]   ;;  %v1419_v39 = vld [vmem:[#allocation3 + $0x50] ss:$8 sps:$4 sm:$0xff]   ;;  %v1420_v40 = vld [vmem:[#allocation3 + $0x64] ss:$8 sps:$4 sm:$0xff]  }
  0x46   :  { %1184 = vmatpush3.bf16.msra.mxu0 %v1393_v7  ;;  %1372 = vmatpush3.bf16.msra.mxu1 %v1393_v7  ;;  %v1422_v41 = vld [vmem:[#allocation3 + $0x60] ss:$8 sps:$4 sm:$0xff]   ;;  %v1423_v42 = vld [vmem:[#allocation3 + $0x74] ss:$8 sps:$4 sm:$0xff]   ;;  %v1425_v43 = vld [vmem:[#allocation3 + $0x70] ss:$8 sps:$4 sm:$0xff]  }
  0x47   :  { %1185 = vmatprep.subr.bf16.mxu0 %v1394_v8  ;;  %1365 = vmatprep.subr.bf16.mxu1 %v1394_v8  ;;  %v1426_v44 = vld [vmem:[#allocation3 + $0x84] ss:$8 sps:$4 sm:$0xff]   ;;  %v1428_v45 = vld [vmem:[#allocation3 + $0x80] ss:$8 sps:$4 sm:$0xff]   ;;  %v1429_v46 = vld [vmem:[#allocation3 + $0x94] ss:$8 sps:$4 sm:$0xff]  }
  0x48   :  { %v1431_v47 = vld [vmem:[#allocation3 + $0x90] ss:$8 sps:$4 sm:$0xff]   ;;  %v1435_v48 = vld [vmem:[#allocation3 + $0xa4] ss:$8 sps:$4 sm:$0xff]   ;;  %v1437_v49 = vld [vmem:[#allocation3 + $0xa0] ss:$8 sps:$4 sm:$0xff]  }
  0x49   :  { %v1441_v50 = vld [vmem:[#allocation3 + $0xb4] ss:$8 sps:$4 sm:$0xff]   ;;  %v1454_v51 = vld [vmem:[#allocation8 + $0x20] sm:$0xff]   ;;  %v1443_v52 = vld [vmem:[#allocation3 + $0xb0] ss:$8 sps:$4 sm:$0xff]  }
  0x4a   :  { %1186 = vmatpush3.bf16.msra.mxu0 %v1395_v9  ;;  %1373 = vmatpush3.bf16.msra.mxu1 %v1395_v9  ;;  %v1455_v53 = vld [vmem:[#allocation8 + $0x28] sm:$0xff]   ;;  %v1456_v54 = vld [vmem:[#allocation8 + $0x30] sm:$0xff]   ;;  %v1457_v55 = vld [vmem:[#allocation8 + $0x38] sm:$0xff]  }
  0x4b   :  { %1187 = vmatprep.subr.bf16.mxu0 %v1396_v10  ;;  %1366 = vmatprep.subr.bf16.mxu1 %v1396_v10 }
  0x4e   :  { %1188 = vmatpush3.bf16.msra.mxu0 %v1397_v12  ;;  %1374 = vmatpush3.bf16.msra.mxu1 %v1397_v12 }
  0x4f   :  { %1189 = vmatprep.subr.bf16.mxu0 %v1398_v13  ;;  %1367 = vmatprep.subr.bf16.mxu1 %v1398_v13 }
  0x52   :  { %1190 = vmatpush3.bf16.msra.mxu0 %v1399_v14  ;;  %1375 = vmatpush3.bf16.msra.mxu1 %v1399_v14 }
  0x53   :  { %1191 = vmatprep.subr.bf16.mxu0 %v1400_v15  ;;  %1368 = vmatprep.subr.bf16.mxu1 %v1400_v15 }
  0x56   :  { %1192 = vmatpush3.bf16.msra.mxu0 %v1401_v16  ;;  %1376 = vmatpush3.bf16.msra.mxu1 %v1401_v16 }
  0x57   :  { %1313 = vmatprep.subr.bf16.mxu1 %v1450_v25 }
  0x59   :  { %481 = vmatmul.mubr.bf16.vlgmr.msra.gmra.mrb[0].mxu0 %v1402_v17  ;;  %577 = vmatmul.mubr.bf16.vlgmr.msra.gmra.mrb[0].mxu1 %v1432_v20 }
  0x5a   :  { %488 = vmatprep.mubr.bf16.mxu0 %v1405_v19  ;;  %584 = vmatprep.mubr.bf16.mxu1 %v1438_v21 }
  0x5b   :  { %1314 = vmatpush3.bf16.msra.mxu1 %v1450_v25 }
  0x5c   :  { %1315 = vmatprep.subr.bf16.mxu1 %v1451_v26 }
  0x5f   :  { %1316 = vmatpush3.bf16.msra.mxu1 %v1451_v26 }
  0x60   :  { %1317 = vmatprep.subr.bf16.mxu1 %v1452_v28 }
  0x61   :  { %489 = vmatmul.mubr.bf16.gmra.mrb[4].mxu0 %v1407_v22  ;;  %585 = vmatmul.mubr.bf16.gmra.mrb[4].mxu1 %v1440_v24 }
  0x62   :  { %496 = vmatprep.mubr.bf16.mxu0 %v1408_v23  ;;  %592 = vmatprep.mubr.bf16.mxu1 %v1444_v27 }
  0x63   :  { %1318 = vmatpush3.bf16.msra.mxu1 %v1452_v28 }
  0x64   :  { %1319 = vmatprep.subr.bf16.mxu1 %v1453_v30 }
  0x67   :  { %1320 = vmatpush3.bf16.msra.mxu1 %v1453_v30 }
  0x68   :  { %1321 = vmatprep.subr.bf16.mxu1 %v1454_v51 }
  0x69   :  { %497 = vmatmul.mubr.bf16.gmra.mrb[8].mxu0 %v1410_v29  ;;  %593 = vmatmul.mubr.bf16.gmra.mrb[8].mxu1 %v1446_v32 }
  0x6a   :  { %504 = vmatprep.mubr.bf16.mxu0 %v1411_v31  ;;  %600 = vmatprep.mubr.bf16.mxu1 %v1447_v33 }
  0x6b   :  { %1322 = vmatpush3.bf16.msra.mxu1 %v1454_v51 }
  0x6c   :  { %1323 = vmatprep.subr.bf16.mxu1 %v1455_v53 }
  0x6f   :  { %1324 = vmatpush3.bf16.msra.mxu1 %v1455_v53 }
  0x70   :  { %1325 = vmatprep.subr.bf16.mxu1 %v1456_v54 }
  0x71   :  { %505 = vmatmul.mubr.bf16.gmra.mrb[12].mxu0 %v1413_v34  ;;  %601 = vmatmul.mubr.bf16.gmra.mrb[12].mxu1 %v1449_v36 }
  0x72   :  { %512 = vmatprep.mubr.bf16.mxu0 %v1414_v35 }
  0x73   :  { %1326 = vmatpush3.bf16.msra.mxu1 %v1456_v54 }
  0x74   :  { %1327 = vmatprep.subr.bf16.mxu1 %v1457_v55 }
  0x77   :  { %1328 = vmatpush3.bf16.msra.mxu1 %v1457_v55 }
  0x79   :  { %513 = vmatmul.mubr.bf16.gmra.mrb[16].mxu0 %v1416_v37 }
  0x7a   :  { %520 = vmatprep.mubr.bf16.mxu0 %v1417_v38 }
  0x81   :  { %521 = vmatmul.mubr.bf16.gmra.mrb[20].mxu0 %v1419_v39 }
  0x82   :  { %528 = vmatprep.mubr.bf16.mxu0 %v1420_v40 }
  0x89   :  { %529 = vmatmul.mubr.bf16.gmra.mrb[24].mxu0 %v1422_v41 }
  0x8a   :  { %536 = vmatprep.mubr.bf16.mxu0 %v1423_v42 }
  0x91   :  { %537 = vmatmul.mubr.bf16.gmra.mrb[28].mxu0 %v1425_v43 }
  0x92   :  { %544 = vmatprep.mubr.bf16.mxu0 %v1426_v44 }
  0x99   :  { %545 = vmatmul.mubr.bf16.gmra.mrb[32].mxu0 %v1428_v45 }
  0x9a   :  { %552 = vmatprep.mubr.bf16.mxu0 %v1429_v46 }
  0xa1   :  { %553 = vmatmul.mubr.bf16.gmra.mrb[36].mxu0 %v1431_v47 }
  0xa2   :  { %560 = vmatprep.mubr.bf16.mxu0 %v1435_v48 }
  0xa9   :  { %561 = vmatmul.mubr.bf16.gmra.mrb[40].mxu0 %v1437_v49 }
  0xaa   :  { %568 = vmatprep.mubr.bf16.mxu0 %v1441_v50 }
  0xb1   :  { %569 = vmatmul.mubr.bf16.gmra.mrb[44].mxu0 %v1443_v52 }
 0x12c   :  { %v1193_v56 = vpop.f32.mrb[0].mxu0  ;;  %v1265_v58 = vpop.f32.mrb[0].mxu1 }
 0x12d   :  { %v1194_v57 = vpop.f32.mrb[1].mxu0  ;;  %v1266_v61 = vpop.f32.mrb[1].mxu1 }
 0x12e   :  { %v1195_v59 = vadd.f32 %v1194_v57, %v1193_v56  ;;  %v1196_v60 = vpop.f32.mrb[2].mxu0  ;;  %v1655_v63 = vadd.f32 %v1266_v61, %v1265_v58  ;;  %v1268_v0 = vpop.f32.mrb[2].mxu1 }
 0x12f   :  { %v1197_v62 = vpop.f32.mrb[3].mxu0  ;;  %v1269_v2 = vpop.f32.mrb[3].mxu1 }
 0x130   :  { %v1198_v1 = vadd.f32 %v1197_v62, %v1196_v60  ;;  %v1657_v3 = vadd.f32 %v1269_v2, %v1268_v0 }
 0x132   :  { %v708_v4 = vpack.c.bf16 %v1198_v1, %v1195_v59  ;;  %v720_v5 = vpack.c.bf16 %v1657_v3, %v1655_v63 }
 0x134   :  { %v1199_v6 = vpop.f32.mrb[4].mxu0  ;;  %1329 = vmatprep.mubr.bf16.mxu1 %v708_v4  ;;  %v1271_v8 = vpop.f32.mrb[4].mxu1 }
 0x135   :  { %v1200_v7 = vpop.f32.mrb[5].mxu0  ;;  %v1272_v11 = vpop.f32.mrb[5].mxu1 }
 0x136   :  { %v1201_v9 = vadd.f32 %v1200_v7, %v1199_v6  ;;  %v1202_v10 = vpop.f32.mrb[6].mxu0  ;;  %v1661_v13 = vadd.f32 %v1272_v11, %v1271_v8  ;;  %v1274_v14 = vpop.f32.mrb[6].mxu1 }
 0x137   :  { %v1203_v12 = vpop.f32.mrb[7].mxu0  ;;  %v1275_v16 = vpop.f32.mrb[7].mxu1 }
 0x138   :  { %v1204_v15 = vadd.f32 %v1203_v12, %v1202_v10  ;;  %v1663_v17 = vadd.f32 %v1275_v16, %v1274_v14 }
 0x13a   :  { %v709_v18 = vpack.c.bf16 %v1204_v15, %v1201_v9  ;;  %v721_v19 = vpack.c.bf16 %v1663_v17, %v1661_v13 }
 0x13c   :  { %v1205_v20 = vpop.f32.mrb[8].mxu0  ;;  %1330 = vmatmul.mubr.bf16.vlgmr.msra.gmra.mrb[16].mxu1 %v709_v18  ;;  %v1277_v22 = vpop.f32.mrb[8].mxu1 }
 0x13d   :  { %v1206_v21 = vpop.f32.mrb[9].mxu0  ;;  %v1278_v25 = vpop.f32.mrb[9].mxu1 }
 0x13e   :  { %v1207_v23 = vadd.f32 %v1206_v21, %v1205_v20  ;;  %v1208_v24 = vpop.f32.mrb[10].mxu0  ;;  %v1667_v27 = vadd.f32 %v1278_v25, %v1277_v22  ;;  %v1280_v28 = vpop.f32.mrb[10].mxu1 }
 0x13f   :  { %v1209_v26 = vpop.f32.mrb[11].mxu0  ;;  %v1281_v30 = vpop.f32.mrb[11].mxu1 }
 0x140   :  { %v1210_v29 = vadd.f32 %v1209_v26, %v1208_v24  ;;  %v1669_v31 = vadd.f32 %v1281_v30, %v1280_v28 }
 0x142   :  { %v710_v32 = vpack.c.bf16 %v1210_v29, %v1207_v23  ;;  %v722_v33 = vpack.c.bf16 %v1669_v31, %v1667_v27 }
 0x144   :  { %v1211_v34 = vpop.f32.mrb[12].mxu0  ;;  %1333 = vmatprep.mubr.bf16.mxu1 %v710_v32  ;;  %v1283_v36 = vpop.f32.mrb[12].mxu1 }
 0x145   :  { %v1212_v35 = vpop.f32.mrb[13].mxu0  ;;  %v1284_v39 = vpop.f32.mrb[13].mxu1 }
 0x146   :  { %v1213_v37 = vadd.f32 %v1212_v35, %v1211_v34  ;;  %v1214_v38 = vpop.f32.mrb[14].mxu0  ;;  %v1673_v41 = vadd.f32 %v1284_v39, %v1283_v36  ;;  %v1286_v42 = vpop.f32.mrb[14].mxu1 }
 0x147   :  { %v1215_v40 = vpop.f32.mrb[15].mxu0  ;;  %v1287_v44 = vpop.f32.mrb[15].mxu1 }
 0x148   :  { %v1216_v43 = vadd.f32 %v1215_v40, %v1214_v38  ;;  %v1675_v45 = vadd.f32 %v1287_v44, %v1286_v42 }
 0x14a   :  { %v711_v46 = vpack.c.bf16 %v1216_v43, %v1213_v37  ;;  %v723_v47 = vpack.c.bf16 %v1675_v45, %v1673_v41 }
 0x14c   :  { %v1217_v48 = vpop.f32.mrb[16].mxu0  ;;  %1334 = vmatmul.mubr.bf16.gmra.mrb[20].mxu1 %v711_v46 }
 0x14d   :  { %v1218_v49 = vpop.f32.mrb[17].mxu0 }
 0x14e   :  { %v1219_v50 = vadd.f32 %v1218_v49, %v1217_v48  ;;  %v1220_v51 = vpop.f32.mrb[18].mxu0 }
 0x14f   :  { %v1221_v52 = vpop.f32.mrb[19].mxu0 }
 0x150   :  { %v1222_v53 = vadd.f32 %v1221_v52, %v1220_v51 }
 0x152   :  { %v712_v54 = vpack.c.bf16 %v1222_v53, %v1219_v50 }
 0x154   :  { %v1223_v55 = vpop.f32.mrb[20].mxu0  ;;  %1337 = vmatprep.mubr.bf16.mxu1 %v712_v54 }
 0x155   :  { %v1224_v56 = vpop.f32.mrb[21].mxu0 }
 0x156   :  { %v1225_v57 = vadd.f32 %v1224_v56, %v1223_v55  ;;  %v1226_v58 = vpop.f32.mrb[22].mxu0 }
 0x157   :  { %v1227_v59 = vpop.f32.mrb[23].mxu0 }
 0x158   :  { %v1228_v60 = vadd.f32 %v1227_v59, %v1226_v58 }
 0x15a   :  { %v713_v61 = vpack.c.bf16 %v1228_v60, %v1225_v57 }
 0x15c   :  { %v1229_v62 = vpop.f32.mrb[24].mxu0  ;;  %1338 = vmatmul.mubr.bf16.gmra.mrb[24].mxu1 %v713_v61 }
 0x15d   :  { %v1230_v0 = vpop.f32.mrb[25].mxu0 }
 0x15e   :  { %v1231_v1 = vadd.f32 %v1230_v0, %v1229_v62  ;;  %v1232_v2 = vpop.f32.mrb[26].mxu0 }
 0x15f   :  { %v1233_v4 = vpop.f32.mrb[27].mxu0 }
 0x160   :  { %v1234_v6 = vadd.f32 %v1233_v4, %v1232_v2 }
 0x162   :  { %v714_v7 = vpack.c.bf16 %v1234_v6, %v1231_v1 }
 0x164   :  { %v1235_v8 = vpop.f32.mrb[28].mxu0  ;;  %1341 = vmatprep.mubr.bf16.mxu1 %v714_v7 }
 0x165   :  { %v1236_v9 = vpop.f32.mrb[29].mxu0 }
 0x166   :  { %v1237_v10 = vadd.f32 %v1236_v9, %v1235_v8  ;;  %v1238_v11 = vpop.f32.mrb[30].mxu0 }
 0x167   :  { %v1239_v12 = vpop.f32.mrb[31].mxu0 }
 0x168   :  { %v1240_v14 = vadd.f32 %v1239_v12, %v1238_v11 }
 0x16a   :  { %v715_v15 = vpack.c.bf16 %v1240_v14, %v1237_v10 }
 0x16c   :  { %v1241_v16 = vpop.f32.mrb[32].mxu0  ;;  %1342 = vmatmul.mubr.bf16.gmra.mrb[28].mxu1 %v715_v15 }
 0x16d   :  { %v1242_v18 = vpop.f32.mrb[33].mxu0 }
 0x16e   :  { %v1243_v20 = vadd.f32 %v1242_v18, %v1241_v16  ;;  %v1244_v21 = vpop.f32.mrb[34].mxu0 }
 0x16f   :  { %v1245_v22 = vpop.f32.mrb[35].mxu0 }
 0x170   :  { %v1246_v23 = vadd.f32 %v1245_v22, %v1244_v21 }
 0x172   :  { %v716_v24 = vpack.c.bf16 %v1246_v23, %v1243_v20 }
 0x174   :  { %v1247_v25 = vpop.f32.mrb[36].mxu0  ;;  %1345 = vmatprep.mubr.bf16.mxu1 %v716_v24 }
 0x175   :  { %v1248_v26 = vpop.f32.mrb[37].mxu0 }
 0x176   :  { %v1249_v28 = vadd.f32 %v1248_v26, %v1247_v25  ;;  %v1250_v29 = vpop.f32.mrb[38].mxu0 }
 0x177   :  { %v1251_v30 = vpop.f32.mrb[39].mxu0 }
 0x178   :  { %v1252_v32 = vadd.f32 %v1251_v30, %v1250_v29 }
 0x17a   :  { %v717_v34 = vpack.c.bf16 %v1252_v32, %v1249_v28 }
 0x17c   :  { %v1253_v35 = vpop.f32.mrb[40].mxu0  ;;  %1346 = vmatmul.mubr.bf16.gmra.mrb[32].mxu1 %v717_v34 }
 0x17d   :  { %v1254_v36 = vpop.f32.mrb[41].mxu0 }
 0x17e   :  { %v1255_v37 = vadd.f32 %v1254_v36, %v1253_v35  ;;  %v1256_v38 = vpop.f32.mrb[42].mxu0 }
 0x17f   :  { %v1257_v39 = vpop.f32.mrb[43].mxu0 }
 0x180   :  { %v1258_v40 = vadd.f32 %v1257_v39, %v1256_v38 }
 0x182   :  { %v718_v42 = vpack.c.bf16 %v1258_v40, %v1255_v37 }
 0x184   :  { %v1259_v43 = vpop.f32.mrb[44].mxu0  ;;  %1349 = vmatprep.mubr.bf16.mxu1 %v718_v42 }
 0x185   :  { %v1260_v44 = vpop.f32.mrb[45].mxu0 }
 0x186   :  { %v1261_v46 = vadd.f32 %v1260_v44, %v1259_v43  ;;  %v1262_v48 = vpop.f32.mrb[46].mxu0 }
 0x187   :  { %v1263_v49 = vpop.f32.mrb[47].mxu0 }
 0x188   :  { %v1264_v50 = vadd.f32 %v1263_v49, %v1262_v48 }
 0x18a   :  { %v719_v51 = vpack.c.bf16 %v1264_v50, %v1261_v46 }
 0x18c   :  { %1350 = vmatmul.mubr.bf16.gmra.mrb[36].mxu1 %v719_v51 }
 0x18d   :  { %1353 = vmatprep.mubr.bf16.mxu1 %v720_v5 }
 0x194   :  { %1354 = vmatmul.mubr.bf16.gmra.mrb[40].mxu1 %v721_v19 }
 0x195   :  { %1357 = vmatprep.mubr.bf16.mxu1 %v722_v33 }
 0x19c   :  { %1358 = vmatmul.mubr.bf16.gmra.mrb[44].mxu1 %v723_v47 }
 0x20f   :  { %v1331_v52 = vpop.f32.mrb[16].mxu1 }
 0x210   :  { %951 = vst [vmem:[#allocation9 + $0x10] sm:$0xff] %v1331_v52  ;;  %v822_v53 = vpop.f32.mrb[17].mxu1  ;;  %v1021_v17 = vmul.f32 %v1331_v52, %v1331_v52 }
 0x211   :  { %949 = vst [vmem:[#allocation9] sm:$0xff] %v822_v53  ;;  %v1332_v54 = vpop.f32.mrb[18].mxu1  ;;  %v1019_v3 = vmul.f32 %v822_v53, %v822_v53 }
 0x212   :  { %952 = vst [vmem:[#allocation9 + $0x18] sm:$0xff] %v1332_v54  ;;  %v825_v63 = vpop.f32.mrb[19].mxu1  ;;  %v1022_v27 = vmul.f32 %v1332_v54, %v1332_v54 }
 0x213   :  { %950 = vst [vmem:[#allocation9 + $0x8] sm:$0xff] %v825_v63  ;;  %v981_v5 = vadd.f32 %v825_v63, %v822_v53  ;;  %v1020_v13 = vmul.f32 %v825_v63, %v825_v63 }
 0x215   :  { %v982_v19 = vadd.f32 %v1331_v52, %v981_v5  ;;  %v1051_v55 = vadd.f32 %v1020_v13, %v1019_v3 }
 0x217   :  { %v1052_v31 = vadd.f32 %v1051_v55, %v1021_v17  ;;  %v983_v33 = vadd.f32 %v1332_v54, %v982_v19 }
 0x219   :  { %v1053_v56 = vadd.f32 %v1052_v31, %v1022_v27 }
 0x21f   :  { %v1335_v41 = vpop.f32.mrb[20].mxu1 }
 0x220   :  { %955 = vst [vmem:[#allocation9 + $0x30] sm:$0xff] %v1335_v41  ;;  %v838_v45 = vpop.f32.mrb[21].mxu1  ;;  %v1025_v0 = vmul.f32 %v1335_v41, %v1335_v41 }
 0x221   :  { %953 = vst [vmem:[#allocation9 + $0x20] sm:$0xff] %v838_v45  ;;  %v984_v47 = vadd.f32 %v983_v33, %v838_v45  ;;  %v1023_v57 = vmul.f32 %v838_v45, %v838_v45  ;;  %v1336_v58 = vpop.f32.mrb[22].mxu1 }
 0x222   :  { %956 = vst [vmem:[#allocation9 + $0x38] sm:$0xff] %v1336_v58  ;;  %v841_v59 = vpop.f32.mrb[23].mxu1  ;;  %v1026_v4 = vmul.f32 %v1336_v58, %v1336_v58 }
 0x223   :  { %v1054_v60 = vadd.f32 %v1053_v56, %v1023_v57  ;;  %954 = vst [vmem:[#allocation9 + $0x28] sm:$0xff] %v841_v59  ;;  %v985_v61 = vadd.f32 %v984_v47, %v841_v59  ;;  %v1024_v62 = vmul.f32 %v841_v59, %v841_v59 }
 0x225   :  { %v986_v1 = vadd.f32 %v1335_v41, %v985_v61  ;;  %v1055_v2 = vadd.f32 %v1054_v60, %v1024_v62 }
 0x227   :  { %v1056_v6 = vadd.f32 %v1055_v2, %v1025_v0  ;;  %v987_v7 = vadd.f32 %v1336_v58, %v986_v1 }
 0x229   :  { %v1057_v8 = vadd.f32 %v1056_v6, %v1026_v4 }
 0x22f   :  { %v1339_v9 = vpop.f32.mrb[24].mxu1 }
 0x230   :  { %959 = vst [vmem:[#allocation9 + $0x50] sm:$0xff] %v1339_v9  ;;  %v854_v10 = vpop.f32.mrb[25].mxu1  ;;  %v1029_v21 = vmul.f32 %v1339_v9, %v1339_v9 }
 0x231   :  { %957 = vst [vmem:[#allocation9 + $0x40] sm:$0xff] %v854_v10  ;;  %v988_v11 = vadd.f32 %v987_v7, %v854_v10  ;;  %v1027_v12 = vmul.f32 %v854_v10, %v854_v10  ;;  %v1340_v14 = vpop.f32.mrb[26].mxu1 }
 0x232   :  { %960 = vst [vmem:[#allocation9 + $0x58] sm:$0xff] %v1340_v14  ;;  %v857_v15 = vpop.f32.mrb[27].mxu1  ;;  %v1030_v24 = vmul.f32 %v1340_v14, %v1340_v14 }
 0x233   :  { %v1058_v16 = vadd.f32 %v1057_v8, %v1027_v12  ;;  %958 = vst [vmem:[#allocation9 + $0x48] sm:$0xff] %v857_v15  ;;  %v989_v18 = vadd.f32 %v988_v11, %v857_v15  ;;  %v1028_v20 = vmul.f32 %v857_v15, %v857_v15 }
 0x235   :  { %v990_v22 = vadd.f32 %v1339_v9, %v989_v18  ;;  %v1059_v23 = vadd.f32 %v1058_v16, %v1028_v20 }
 0x237   :  { %v1060_v25 = vadd.f32 %v1059_v23, %v1029_v21  ;;  %v991_v26 = vadd.f32 %v1340_v14, %v990_v22 }
 0x239   :  { %v1061_v28 = vadd.f32 %v1060_v25, %v1030_v24 }
 0x23f   :  { %v1343_v29 = vpop.f32.mrb[28].mxu1 }
 0x240   :  { %963 = vst [vmem:[#allocation9 + $0x70] sm:$0xff] %v1343_v29  ;;  %v870_v30 = vpop.f32.mrb[29].mxu1  ;;  %v1033_v40 = vmul.f32 %v1343_v29, %v1343_v29 }
 0x241   :  { %961 = vst [vmem:[#allocation9 + $0x60] sm:$0xff] %v870_v30  ;;  %v992_v32 = vadd.f32 %v991_v26, %v870_v30  ;;  %v1031_v34 = vmul.f32 %v870_v30, %v870_v30  ;;  %v1344_v35 = vpop.f32.mrb[30].mxu1 }
 0x242   :  { %964 = vst [vmem:[#allocation9 + $0x78] sm:$0xff] %v1344_v35  ;;  %v873_v36 = vpop.f32.mrb[31].mxu1  ;;  %v1034_v44 = vmul.f32 %v1344_v35, %v1344_v35 }
 0x243   :  { %v1062_v37 = vadd.f32 %v1061_v28, %v1031_v34  ;;  %962 = vst [vmem:[#allocation9 + $0x68] sm:$0xff] %v873_v36  ;;  %v993_v38 = vadd.f32 %v992_v32, %v873_v36  ;;  %v1032_v39 = vmul.f32 %v873_v36, %v873_v36 }
 0x245   :  { %v994_v42 = vadd.f32 %v1343_v29, %v993_v38  ;;  %v1063_v43 = vadd.f32 %v1062_v37, %v1032_v39 }
 0x247   :  { %v1064_v46 = vadd.f32 %v1063_v43, %v1033_v40  ;;  %v995_v48 = vadd.f32 %v1344_v35, %v994_v42 }
 0x249   :  { %v1065_v49 = vadd.f32 %v1064_v46, %v1034_v44 }
 0x24f   :  { %v1347_v50 = vpop.f32.mrb[32].mxu1 }
 0x250   :  { %967 = vst [vmem:[#allocation9 + $0x90] sm:$0xff] %v1347_v50  ;;  %v886_v51 = vpop.f32.mrb[33].mxu1  ;;  %v1037_v17 = vmul.f32 %v1347_v50, %v1347_v50 }
 0x251   :  { %965 = vst [vmem:[#allocation9 + $0x80] sm:$0xff] %v886_v51  ;;  %v996_v52 = vadd.f32 %v995_v48, %v886_v51  ;;  %v1035_v53 = vmul.f32 %v886_v51, %v886_v51  ;;  %v1348_v54 = vpop.f32.mrb[34].mxu1 }
 0x252   :  { %968 = vst [vmem:[#allocation9 + $0x98] sm:$0xff] %v1348_v54  ;;  %v889_v63 = vpop.f32.mrb[35].mxu1  ;;  %v1038_v27 = vmul.f32 %v1348_v54, %v1348_v54 }
 0x253   :  { %v1066_v3 = vadd.f32 %v1065_v49, %v1035_v53  ;;  %966 = vst [vmem:[#allocation9 + $0x88] sm:$0xff] %v889_v63  ;;  %v997_v5 = vadd.f32 %v996_v52, %v889_v63  ;;  %v1036_v13 = vmul.f32 %v889_v63, %v889_v63 }
 0x255   :  { %v998_v19 = vadd.f32 %v1347_v50, %v997_v5  ;;  %v1067_v55 = vadd.f32 %v1066_v3, %v1036_v13 }
 0x257   :  { %v1068_v31 = vadd.f32 %v1067_v55, %v1037_v17  ;;  %v999_v33 = vadd.f32 %v1348_v54, %v998_v19 }
 0x259   :  { %v1069_v56 = vadd.f32 %v1068_v31, %v1038_v27 }
 0x25f   :  { %v1351_v41 = vpop.f32.mrb[36].mxu1 }
 0x260   :  { %971 = vst [vmem:[#allocation9 + $0xb0] sm:$0xff] %v1351_v41  ;;  %v902_v45 = vpop.f32.mrb[37].mxu1  ;;  %v1041_v0 = vmul.f32 %v1351_v41, %v1351_v41 }
 0x261   :  { %969 = vst [vmem:[#allocation9 + $0xa0] sm:$0xff] %v902_v45  ;;  %v1000_v47 = vadd.f32 %v999_v33, %v902_v45  ;;  %v1039_v57 = vmul.f32 %v902_v45, %v902_v45  ;;  %v1352_v58 = vpop.f32.mrb[38].mxu1 }
 0x262   :  { %972 = vst [vmem:[#allocation9 + $0xb8] sm:$0xff] %v1352_v58  ;;  %v905_v59 = vpop.f32.mrb[39].mxu1  ;;  %v1042_v4 = vmul.f32 %v1352_v58, %v1352_v58 }
 0x263   :  { %v1070_v60 = vadd.f32 %v1069_v56, %v1039_v57  ;;  %970 = vst [vmem:[#allocation9 + $0xa8] sm:$0xff] %v905_v59  ;;  %v1001_v61 = vadd.f32 %v1000_v47, %v905_v59  ;;  %v1040_v62 = vmul.f32 %v905_v59, %v905_v59 }
 0x265   :  { %v1002_v1 = vadd.f32 %v1351_v41, %v1001_v61  ;;  %v1071_v2 = vadd.f32 %v1070_v60, %v1040_v62 }
 0x267   :  { %v1072_v6 = vadd.f32 %v1071_v2, %v1041_v0  ;;  %v1355_v7 = vpop.f32.mrb[40].mxu1  ;;  %v1003_v8 = vadd.f32 %v1352_v58, %v1002_v1 }
 0x268   :  { %975 = vst [vmem:[#allocation9 + $0xd0] sm:$0xff] %v1355_v7  ;;  %v918_v9 = vpop.f32.mrb[41].mxu1  ;;  %v1045_v21 = vmul.f32 %v1355_v7, %v1355_v7 }
 0x269   :  { %973 = vst [vmem:[#allocation9 + $0xc0] sm:$0xff] %v918_v9  ;;  %v1004_v10 = vadd.f32 %v1003_v8, %v918_v9  ;;  %v1043_v11 = vmul.f32 %v918_v9, %v918_v9  ;;  %v1073_v12 = vadd.f32 %v1072_v6, %v1042_v4  ;;  %v1356_v14 = vpop.f32.mrb[42].mxu1 }
 0x26a   :  { %976 = vst [vmem:[#allocation9 + $0xd8] sm:$0xff] %v1356_v14  ;;  %v921_v15 = vpop.f32.mrb[43].mxu1  ;;  %v1046_v24 = vmul.f32 %v1356_v14, %v1356_v14 }
 0x26b   :  { %v1074_v16 = vadd.f32 %v1073_v12, %v1043_v11  ;;  %974 = vst [vmem:[#allocation9 + $0xc8] sm:$0xff] %v921_v15  ;;  %v1005_v18 = vadd.f32 %v1004_v10, %v921_v15  ;;  %v1044_v20 = vmul.f32 %v921_v15, %v921_v15 }
 0x26d   :  { %v1006_v22 = vadd.f32 %v1355_v7, %v1005_v18  ;;  %v1075_v23 = vadd.f32 %v1074_v16, %v1044_v20 }
 0x26f   :  { %v1076_v25 = vadd.f32 %v1075_v23, %v1045_v21  ;;  %v1359_v26 = vpop.f32.mrb[44].mxu1  ;;  %v1007_v28 = vadd.f32 %v1356_v14, %v1006_v22 }
 0x270   :  { %979 = vst [vmem:[#allocation9 + $0xf0] sm:$0xff] %v1359_v26  ;;  %v934_v29 = vpop.f32.mrb[45].mxu1 }
 0x271   :  { %977 = vst [vmem:[#allocation9 + $0xe0] sm:$0xff] %v934_v29  ;;  %v1008_v30 = vadd.f32 %v1007_v28, %v934_v29  ;;  %v1047_v32 = vmul.f32 %v934_v29, %v934_v29  ;;  %v1077_v34 = vadd.f32 %v1076_v25, %v1046_v24  ;;  %v1360_v35 = vpop.f32.mrb[46].mxu1 }
 0x272   :  { %980 = vst [vmem:[#allocation9 + $0xf8] sm:$0xff] %v1360_v35  ;;  %v937_v36 = vpop.f32.mrb[47].mxu1 }
 0x273   :  { %v1078_v37 = vadd.f32 %v1077_v34, %v1047_v32  ;;  %978 = vst [vmem:[#allocation9 + $0xe8] sm:$0xff] %v937_v36  ;;  %v1009_v38 = vadd.f32 %v1008_v30, %v937_v36  ;;  %v1048_v39 = vmul.f32 %v937_v36, %v937_v36 }
 0x274   :  { %1535 = shalt.err (!%p1532_p0)
}
 0x275   :  { %s1536_s5 = scalar_lea.hbm %s1721_s3, 4096 }
 0x276   :  { %p1537_p1 = scmp.ne.s32.totalorder %s1721_s3, %s1536_s5  ;;  %p1540_p2 = scmp.lt.u32.totalorder %s1536_s5, %s1721_s3 }
 0x278   :  { %p1542_p3 = pnand %p1540_p2, %p1537_p1 }
 0x27a   :  { %1545 = shalt.err (!%p1542_p3)
}
 0x27b   :  { %1100 = dma.vmem_to_hbm [thread:$0]  %s1095_s25, 4096, %s1721_s3, [#allocation5], %s1580_s1, %s1580_s1, %s1581_s13   ;;  %v1049_v40 = vmul.f32 %v1359_v26, %v1359_v26  ;;  %v1010_v42 = vadd.f32 %v1359_v26, %v1009_v38  ;;  %v1079_v43 = vadd.f32 %v1078_v37, %v1048_v39  ;;  %v1050_v44 = vmul.f32 %v1360_v35, %v1360_v35 }
 0x27c   :  { %s1584_s12 = smov [#allocation10]  }
 0x27d   :  { %v1011_v46 = vadd.f32 %v1360_v35, %v1010_v42  ;;  %v1080_v48 = vadd.f32 %v1079_v43, %v1049_v40  ;;  %s1107_s14 = sshll.u32 %s1584_s12, 4  ;;  %s1108_s14 = int_to_ptr.vmem [resolvable:$true] %s1107_s14 }
 0x27e   :  { %s1546_s3 = scalar_lea.vmem %s1108_s14, 32  ;;  %p1551_p5 = scmp.lt.s32.totalorder %s1108_s14, %s1108_s14 }
 0x27f   :  { %v1012_v49 = vrot.slane %v1011_v46, 4  ;;  %v1081_v50 = vadd.f32 %v1080_v48, %v1050_v44  ;;  %p1547_p4 = scmp.ne.s32.totalorder %s1108_s14, %s1546_s3  ;;  %p1552_p6 = scmp.lt.s32.totalorder %s1546_s3, %s1546_s3 }
 0x281   :  { %v1013_v51 = vadd.f32 %v1012_v49, %v1011_v46  ;;  %v1082_v52 = vrot.slane %v1081_v50, 4  ;;  %p1553_p7 = por %p1552_p6, %p1551_p5 }
 0x283   :  { %v1014_v53 = vrot.slane %v1013_v51, 2  ;;  %v1083_v54 = vadd.f32 %v1082_v52, %v1081_v50  ;;  %p1554_p8 = pnand %p1553_p7, %p1547_p4 }
 0x285   :  { %v1015_v63 = vadd.f32 %v1014_v53, %v1013_v51  ;;  %v1084_v3 = vrot.slane %v1083_v54, 2 }
 0x287   :  { %v1016_v5 = vrot.slane %v1015_v63, 1  ;;  %v1085_v13 = vadd.f32 %v1084_v3, %v1083_v54 }
 0x289   :  { %v1017_v17 = vadd.f32 %v1016_v5, %v1015_v63  ;;  %v1086_v19 = vrot.slane %v1085_v13, 1 }
 0x28b   :  { %1018 = vst [vmem:[#allocation10] sm:$0x1] %v1017_v17  ;;  %v1087_v55 = vadd.f32 %v1086_v19, %v1085_v13 }
 0x28d   :  { %1088 = vst [vmem:[#allocation10 + $0x1] sm:$0x1] %v1087_v55 }
 0x28e   :  { %1557 = shalt.err (!%p1554_p8)
}
 0x28f   :  { %s1558_s15 = scalar_lea.hbm %s1722_s4, 32 }
 0x290   :  { %p1559_p9 = scmp.ne.s32.totalorder %s1722_s4, %s1558_s15  ;;  %p1562_p10 = scmp.lt.u32.totalorder %s1558_s15, %s1722_s4 }
 0x292   :  { %p1564_p11 = pnand %p1562_p10, %p1559_p9 }
 0x294   :  { %1567 = shalt.err (!%p1564_p11)
}
 0x295   :  { %1110 = dma.vmem_to_hbm [thread:$0]  %s1108_s14, 32, %s1722_s4, [#allocation11]  }
 0x296   :  { %1572 = dma.done.wait [#allocation5], 4096  }
 0x297   :  { %1573 = vsyncadd [#allocation5], 4294963200 }
 0x298   :  { %1574 = dma.done.wait [#allocation11], 32  }
 0x299   :  { %1575 = vsyncadd [#allocation11], 4294967264 }
 0x29a   :  { %1117 = vsyncpa [#allocation4], 1 }
 0x29b   :  { %1118 = vsyncpa [#allocation7], 1 }
 0x29c   :  { %1119 = vsyncpa [#allocation5], 1 }
 0x29d   :  { %1120 = vsyncpa [#allocation11], 1 }

</bundles_post_ra>
